<compile_context>
chip_gen: v7x
topology: tpu7x:2x2x1
jax: 0.10.0
libtpu: 0.0.40
codegen_flags: <defaults>
</compile_context>

<pallas_src>
import jax
import jax.numpy as jnp
from jax.experimental import pallas as pl
from jax.experimental.pallas import tpu as pltpu


def _round_up(n, m):
    return ((n + m - 1) // m) * m


def _mlp_kernel(xT_ref, w1_ref, b1_ref, w2_ref, b2_ref, w3_ref, b3_ref,
                w4_ref, b4_ref, o_ref):
    # All activations are batch-on-lanes: (features, tb).
    # Layer 1: (H, in) @ (in, tb) + (H, 1) -> ReLU   (f32 accumulation)
    h = jnp.dot(w1_ref[...], xT_ref[...], preferred_element_type=jnp.float32)
    h = jnp.maximum(h + b1_ref[...], 0.0)

    # Layer 2: (H, H) @ (H, tb) + (H, 1) -> ReLU
    h = jnp.dot(w2_ref[...], h.astype(w2_ref.dtype),
                preferred_element_type=jnp.float32)
    h = jnp.maximum(h + b2_ref[...], 0.0)

    # Layer 3: (H, H) @ (H, tb) + (H, 1) -> ReLU
    h = jnp.dot(w3_ref[...], h.astype(w3_ref.dtype),
                preferred_element_type=jnp.float32)
    h = jnp.maximum(h + b3_ref[...], 0.0)

    # Output head: (1, H) @ (H, tb) -> (1, tb); lane-dense, no transpose needed.
    out = jnp.dot(w4_ref[...], h.astype(w4_ref.dtype),
                  preferred_element_type=jnp.float32)
    o_ref[...] = (out + b4_ref[...]).astype(o_ref.dtype)


def _full_spec(a):
    nd = a.ndim
    # Constant index map -> block fetched once and kept resident in VMEM.
    return pl.BlockSpec(a.shape, lambda i: (0,) * nd)


def fnn_soh_forward(x, params, *, tb=4096, use_bf16=False):
    """x: (B, input_size) float32; params: dict of weights/biases. Returns (B, 1) f32.

    Set use_bf16=True on v6e/v7x for bf16 matmul operands (f32 accumulation,
    f32 biases/ReLU) -- halves x DMA bytes and feeds the native bf16 MXU.
    """
    B, in_size = x.shape
    H = params["w1"].shape[1]

    # Batch-on-lanes layout: weights in (out, in) form, biases as (out, 1).
    w1t = params["w1"].T                 # (H, in_size)
    w2t = params["w2"].T                 # (H, H)
    w3t = params["w3"].T                 # (H, H)
    w4r = params["w4"].reshape(1, H)     # (1, H)
    b1c = params["b1"].reshape(H, 1)
    b2c = params["b2"].reshape(H, 1)
    b3c = params["b3"].reshape(H, 1)
    b4c = params["b4"].reshape(1, 1)

    # Batch tile: multiple of 128 (lane-dense output), large for throughput.
    if B <= tb:
        if B >= 256:
            # Force >= 2 tiles so both v7x TensorCores shard the "parallel" axis.
            tb_eff = _round_up(pl.cdiv(B, 2), 128)
        else:
            tb_eff = _round_up(B, 128)
    else:
        tb_eff = _round_up(tb, 128)
    grid = pl.cdiv(B, tb_eff)
    B_pad = grid * tb_eff

    # Transpose to (in_size, B) so the 16 features sit on sublanes and the
    # batch fills the lanes; zero-pad the batch to a whole number of tiles.
    xT = jnp.pad(x.T, ((0, 0), (0, B_pad - B)))

    op_dtype = jnp.bfloat16 if use_bf16 else x.dtype
    if use_bf16:
        xT = xT.astype(op_dtype)
        w1t, w2t, w3t, w4r = (w.astype(op_dtype) for w in (w1t, w2t, w3t, w4r))

    # VMEM budget from the actual tile footprint (double-buffered xT / output
    # row, resident weights, live (H, tb) f32 activations), capped well below
    # v7x's 64 MiB physical VMEM to leave compiler headroom.
    itemsize = jnp.dtype(op_dtype).itemsize
    est = (2 * in_size * tb_eff * itemsize                      # xT tiles
           + 2 * 8 * tb_eff * 4                                 # output row
           + 2 * (w1t.size + w2t.size + w3t.size + w4r.size) * itemsize
           + 2 * (b1c.size + b2c.size + b3c.size + b4c.size) * 4 * 128
           + 4 * H * tb_eff * 4)                                # live activations
    vmem_limit = int(min(max(2 * est, 16 * 1024 * 1024), 48 * 1024 * 1024))

    out_row = pl.pallas_call(
        _mlp_kernel,
        out_shape=jax.ShapeDtypeStruct((1, B_pad), jnp.float32),
        grid_spec=pltpu.PrefetchScalarGridSpec(
            num_scalar_prefetch=0,
            grid=(grid,),
            in_specs=[
                # xT: full feature depth on sublanes, batch tile on lanes.
                pl.BlockSpec((in_size, tb_eff), lambda i: (0, i)),
                # Weights / biases: constant index maps -> fetched once, resident.
                _full_spec(w1t), _full_spec(b1c),
                _full_spec(w2t), _full_spec(b2c),
                _full_spec(w3t), _full_spec(b3c),
                _full_spec(w4r), _full_spec(b4c),
            ],
            # Lane-dense output: one (1, tb) row per grid step, batch on lanes.
            out_specs=pl.BlockSpec((1, tb_eff), lambda i: (0, i)),
        ),
        compiler_params=pltpu.CompilerParams(
            # "parallel" shards the batch axis across TensorCores on v7x.
            dimension_semantics=("parallel",),
            vmem_limit_bytes=vmem_limit),
    )(xT, w1t, b1c, w2t, b2c, w3t, b3c, w4r, b4c)

    # (1, B_pad) lane-dense slab -> (B, 1) column expected by the module.
    return out_row.reshape(B_pad, 1)[:B]


def init_params(key, input_size, hidden_size=64):
    """Deterministic init mirroring nn.Linear's uniform(-1/sqrt(fan_in), 1/sqrt(fan_in))."""
    def linear(key, fan_in, fan_out):
        kw, kb = jax.random.split(key)
        bound = 1.0 / jnp.sqrt(fan_in)
        w = jax.random.uniform(kw, (fan_in, fan_out), jnp.float32, -bound, bound)
        b = jax.random.uniform(kb, (1, fan_out), jnp.float32, -bound, bound)
        return w, b

    k1, k2, k3, k4 = jax.random.split(key, 4)
    w1, b1 = linear(k1, input_size, hidden_size)
    w2, b2 = linear(k2, hidden_size, hidden_size)
    w3, b3 = linear(k3, hidden_size, hidden_size)
    w4, b4 = linear(k4, hidden_size, 1)
    return dict(w1=w1, b1=b1, w2=w2, b2=b2, w3=w3, b3=b3, w4=w4, b4=b4)


def fnn_soh_ref(x, p):
    h = jnp.maximum(x @ p["w1"] + p["b1"], 0.0)
    h = jnp.maximum(h @ p["w2"] + p["b2"], 0.0)
    h = jnp.maximum(h @ p["w3"] + p["b3"], 0.0)
    return h @ p["w4"] + p["b4"]


if __name__ == "__main__":
    key = jax.random.PRNGKey(0)
    kx, kx2, kp = jax.random.split(key, 3)

    input_size, hidden = 16, 64
    params = init_params(kp, input_size, hidden)

    # Small single-tile case (B=16 -> tb_eff=128, grid=1, zero-padded lanes).
    x_small = jax.random.normal(kx, (16, input_size), jnp.float32)
    out = jax.block_until_ready(fnn_soh_forward(x_small, params))
    ref = fnn_soh_ref(x_small, params)
    assert out.shape == (16, 1)
    assert jnp.allclose(out, ref, atol=1e-4, rtol=1e-4)

    # Mid-size case: exercises the forced >=2-tile split (B=300 -> tb_eff=256,
    # grid=2) plus batch padding and the lane-dense output.
    x_big = jax.random.normal(kx2, (300, input_size), jnp.float32)
    out_big = jax.block_until_ready(fnn_soh_forward(x_big, params))
    ref_big = fnn_soh_ref(x_big, params)
    assert out_big.shape == (300, 1)
    assert jnp.allclose(out_big, ref_big, atol=1e-4, rtol=1e-4)

    # Explicit small tile -> grid=3 multi-tile path.
    out_tiled = jax.block_until_ready(fnn_soh_forward(x_big, params, tb=128))
    assert jnp.allclose(out_tiled, ref_big, atol=1e-4, rtol=1e-4)

    # bf16-operand path (f32 accumulation) recommended for v6e/v7x inference.
    out_bf16 = jax.block_until_ready(fnn_soh_forward(x_big, params, use_bf16=True))
    assert out_bf16.shape == (300, 1)
    assert jnp.allclose(out_bf16, ref_big, atol=1e-1, rtol=1e-1)

    print("KERNEL_OK")
</pallas_src>

<mosaic_0001>
module attributes {stable_mosaic.version = 11 : i64} {
  func.func @_mlp_kernel(%arg0: i32, %arg1: memref<16x128xf32, #tpu.memory_space<vmem>>, %arg2: memref<64x16xf32, #tpu.memory_space<vmem>>, %arg3: memref<64x1xf32, #tpu.memory_space<vmem>>, %arg4: memref<64x64xf32, #tpu.memory_space<vmem>>, %arg5: memref<64x1xf32, #tpu.memory_space<vmem>>, %arg6: memref<64x64xf32, #tpu.memory_space<vmem>>, %arg7: memref<64x1xf32, #tpu.memory_space<vmem>>, %arg8: memref<1x64xf32, #tpu.memory_space<vmem>>, %arg9: memref<1x1xf32, #tpu.memory_space<vmem>>, %arg10: memref<1x128xf32, #tpu.memory_space<vmem>>) attributes {dimension_semantics = [#tpu.dimension_semantics<parallel>], iteration_bounds = array<i64: 1>, scalar_prefetch = 0 : i64, scratch_operands = 0 : i64, tpu.core_type = #tpu.core_type<tc>, window_params = [{transform_indices = @transform_0, window_bounds = array<i64: 16, 128>}, {pipeline_mode = #tpu.pipeline_mode<synchronous>, transform_indices = @transform_1, window_bounds = array<i64: 64, 16>}, {pipeline_mode = #tpu.pipeline_mode<synchronous>, transform_indices = @transform_2, window_bounds = array<i64: 64, 1>}, {pipeline_mode = #tpu.pipeline_mode<synchronous>, transform_indices = @transform_3, window_bounds = array<i64: 64, 64>}, {pipeline_mode = #tpu.pipeline_mode<synchronous>, transform_indices = @transform_4, window_bounds = array<i64: 64, 1>}, {pipeline_mode = #tpu.pipeline_mode<synchronous>, transform_indices = @transform_5, window_bounds = array<i64: 64, 64>}, {pipeline_mode = #tpu.pipeline_mode<synchronous>, transform_indices = @transform_6, window_bounds = array<i64: 64, 1>}, {pipeline_mode = #tpu.pipeline_mode<synchronous>, transform_indices = @transform_7, window_bounds = array<i64: 1, 64>}, {pipeline_mode = #tpu.pipeline_mode<synchronous>, transform_indices = @transform_8, window_bounds = array<i64: 1, 1>}, {transform_indices = @transform_9, window_bounds = array<i64: 1, 128>}]} {
    %c0 = arith.constant 0 : index
    %c0_0 = arith.constant 0 : index
    %0 = vector.load %arg2[%c0, %c0_0] : memref<64x16xf32, #tpu.memory_space<vmem>>, vector<64x16xf32>
    %c0_1 = arith.constant 0 : index
    %c0_2 = arith.constant 0 : index
    %1 = vector.load %arg1[%c0_1, %c0_2] : memref<16x128xf32, #tpu.memory_space<vmem>>, vector<16x128xf32>
    %cst = arith.constant dense<0.000000e+00> : vector<64x128xf32>
    %2 = tpu.matmul %0, %1, %cst {dimension_numbers = #tpu.dot_dimension_numbers<[1], [0], [0], [1], [0, 0, 1, 1], [], []>} : vector<64x16xf32>, vector<16x128xf32>, vector<64x128xf32> -> vector<64x128xf32>
    %c0_3 = arith.constant 0 : index
    %c0_4 = arith.constant 0 : index
    %3 = vector.load %arg3[%c0_3, %c0_4] : memref<64x1xf32, #tpu.memory_space<vmem>>, vector<64x1xf32>
    %4 = vector.broadcast %3 : vector<64x1xf32> to vector<64x128xf32>
    %5 = arith.addf %2, %4 : vector<64x128xf32>
    %cst_5 = arith.constant 0.000000e+00 : f32
    %6 = vector.broadcast %cst_5 : f32 to vector<64x128xf32>
    %7 = arith.maximumf %5, %6 : vector<64x128xf32>
    %c0_6 = arith.constant 0 : index
    %c0_7 = arith.constant 0 : index
    %8 = vector.load %arg4[%c0_6, %c0_7] : memref<64x64xf32, #tpu.memory_space<vmem>>, vector<64x64xf32>
    %cst_8 = arith.constant dense<0.000000e+00> : vector<64x128xf32>
    %9 = tpu.matmul %8, %7, %cst_8 {dimension_numbers = #tpu.dot_dimension_numbers<[1], [0], [0], [1], [0, 0, 1, 1], [], []>} : vector<64x64xf32>, vector<64x128xf32>, vector<64x128xf32> -> vector<64x128xf32>
    %c0_9 = arith.constant 0 : index
    %c0_10 = arith.constant 0 : index
    %10 = vector.load %arg5[%c0_9, %c0_10] : memref<64x1xf32, #tpu.memory_space<vmem>>, vector<64x1xf32>
    %11 = vector.broadcast %10 : vector<64x1xf32> to vector<64x128xf32>
    %12 = arith.addf %9, %11 : vector<64x128xf32>
    %cst_11 = arith.constant 0.000000e+00 : f32
    %13 = vector.broadcast %cst_11 : f32 to vector<64x128xf32>
    %14 = arith.maximumf %12, %13 : vector<64x128xf32>
    %c0_12 = arith.constant 0 : index
    %c0_13 = arith.constant 0 : index
    %15 = vector.load %arg6[%c0_12, %c0_13] : memref<64x64xf32, #tpu.memory_space<vmem>>, vector<64x64xf32>
    %cst_14 = arith.constant dense<0.000000e+00> : vector<64x128xf32>
    %16 = tpu.matmul %15, %14, %cst_14 {dimension_numbers = #tpu.dot_dimension_numbers<[1], [0], [0], [1], [0, 0, 1, 1], [], []>} : vector<64x64xf32>, vector<64x128xf32>, vector<64x128xf32> -> vector<64x128xf32>
    %c0_15 = arith.constant 0 : index
    %c0_16 = arith.constant 0 : index
    %17 = vector.load %arg7[%c0_15, %c0_16] : memref<64x1xf32, #tpu.memory_space<vmem>>, vector<64x1xf32>
    %18 = vector.broadcast %17 : vector<64x1xf32> to vector<64x128xf32>
    %19 = arith.addf %16, %18 : vector<64x128xf32>
    %cst_17 = arith.constant 0.000000e+00 : f32
    %20 = vector.broadcast %cst_17 : f32 to vector<64x128xf32>
    %21 = arith.maximumf %19, %20 : vector<64x128xf32>
    %c0_18 = arith.constant 0 : index
    %c0_19 = arith.constant 0 : index
    %22 = vector.load %arg8[%c0_18, %c0_19] : memref<1x64xf32, #tpu.memory_space<vmem>>, vector<1x64xf32>
    %cst_20 = arith.constant dense<0.000000e+00> : vector<1x128xf32>
    %23 = tpu.matmul %22, %21, %cst_20 {dimension_numbers = #tpu.dot_dimension_numbers<[1], [0], [0], [1], [0, 0, 1, 1], [], []>} : vector<1x64xf32>, vector<64x128xf32>, vector<1x128xf32> -> vector<1x128xf32>
    %c0_21 = arith.constant 0 : index
    %c0_22 = arith.constant 0 : index
    %24 = vector.load %arg9[%c0_21, %c0_22] : memref<1x1xf32, #tpu.memory_space<vmem>>, vector<1x1xf32>
    %25 = vector.broadcast %24 : vector<1x1xf32> to vector<1x128xf32>
    %26 = arith.addf %23, %25 : vector<1x128xf32>
    %c0_23 = arith.constant 0 : index
    %c0_24 = arith.constant 0 : index
    %27 = vector.load %arg10[%c0_23, %c0_24] : memref<1x128xf32, #tpu.memory_space<vmem>>, vector<1x128xf32>
    tpu.vector_store %arg10[%c0_23, %c0_24], %26 {strides = array<i32>} : memref<1x128xf32, #tpu.memory_space<vmem>>, vector<1x128xf32>,
    return
  }
  func.func @transform_0(%arg0: i32) -> (i32, i32) {
    %c0_i32 = arith.constant 0 : i32
    %c0_i32_0 = arith.constant 0 : i32
    return %c0_i32, %arg0 : i32, i32
  }
  func.func @transform_1(%arg0: i32) -> (i32, i32) {
    %c0_i32 = arith.constant 0 : i32
    %c0_i32_0 = arith.constant 0 : i32
    %c0_i32_1 = arith.constant 0 : i32
    return %c0_i32, %c0_i32_0 : i32, i32
  }
  func.func @transform_2(%arg0: i32) -> (i32, i32) {
    %c0_i32 = arith.constant 0 : i32
    %c0_i32_0 = arith.constant 0 : i32
    %c0_i32_1 = arith.constant 0 : i32
    return %c0_i32, %c0_i32_0 : i32, i32
  }
  func.func @transform_3(%arg0: i32) -> (i32, i32) {
    %c0_i32 = arith.constant 0 : i32
    %c0_i32_0 = arith.constant 0 : i32
    %c0_i32_1 = arith.constant 0 : i32
    return %c0_i32, %c0_i32_0 : i32, i32
  }
  func.func @transform_4(%arg0: i32) -> (i32, i32) {
    %c0_i32 = arith.constant 0 : i32
    %c0_i32_0 = arith.constant 0 : i32
    %c0_i32_1 = arith.constant 0 : i32
    return %c0_i32, %c0_i32_0 : i32, i32
  }
  func.func @transform_5(%arg0: i32) -> (i32, i32) {
    %c0_i32 = arith.constant 0 : i32
    %c0_i32_0 = arith.constant 0 : i32
    %c0_i32_1 = arith.constant 0 : i32
    return %c0_i32, %c0_i32_0 : i32, i32
  }
  func.func @transform_6(%arg0: i32) -> (i32, i32) {
    %c0_i32 = arith.constant 0 : i32
    %c0_i32_0 = arith.constant 0 : i32
    %c0_i32_1 = arith.constant 0 : i32
    return %c0_i32, %c0_i32_0 : i32, i32
  }
  func.func @transform_7(%arg0: i32) -> (i32, i32) {
    %c0_i32 = arith.constant 0 : i32
    %c0_i32_0 = arith.constant 0 : i32
    %c0_i32_1 = arith.constant 0 : i32
    return %c0_i32, %c0_i32_0 : i32, i32
  }
  func.func @transform_8(%arg0: i32) -> (i32, i32) {
    %c0_i32 = arith.constant 0 : i32
    %c0_i32_0 = arith.constant 0 : i32
    %c0_i32_1 = arith.constant 0 : i32
    return %c0_i32, %c0_i32_0 : i32, i32
  }
  func.func @transform_9(%arg0: i32) -> (i32, i32) {
    %c0_i32 = arith.constant 0 : i32
    %c0_i32_0 = arith.constant 0 : i32
    return %c0_i32, %arg0 : i32, i32
  }
}

</mosaic_0001>

<bundles_post_ra>
// kernel: tpu_custom_call.1
= control target key start
LH: loop header
LB: loop body
LE: loop exit
PB: predicated region body
PF: predicated region fallthrough
CT: control target
= control target key end

     0   :  { %s1211_s0 = inlined_call_operand.vmem [shape: f32[16,128], index: 0, kind: input, shape index: {}]   ;;  %s1212_s1 = inlined_call_operand.vmem [shape: f32[64,16], index: 1, kind: input, shape index: {}]   ;;  %s1213_s2 = inlined_call_operand.vmem [shape: f32[64,1], index: 2, kind: input, shape index: {}]   ;;  %s1214_s3 = inlined_call_operand.vmem [shape: f32[64,64], index: 3, kind: input, shape index: {}]   ;;  %s1215_s4 = inlined_call_operand.vmem [shape: f32[64,1], index: 4, kind: input, shape index: {}]   ;;  %s1216_s5 = inlined_call_operand.vmem [shape: f32[64,64], index: 5, kind: input, shape index: {}]   ;;  %s1217_s6 = inlined_call_operand.vmem [shape: f32[64,1], index: 6, kind: input, shape index: {}]   ;;  %s1218_s7 = inlined_call_operand.vmem [shape: f32[1,64], index: 7, kind: input, shape index: {}]   ;;  %s1219_s8 = inlined_call_operand.<no memory space> [shape: f32[1,1], index: 8, kind: input, shape index: {}]   ;;  %s1220_s9 = inlined_call_operand.hbm [shape: f32[1,128], index: 9, kind: output, shape index: {}]  }
   0x1   :  { %v14_v0 = vstv %s1219_s8 }
   0x2   :  { %15 = vst [vmem:[#allocation2] sm:$0x1] %v14_v0 }
   0x3   :  { %v43_v1 = vld [vmem:[%s1211_s0] sm:$0xff]  ;;  %v44_v2 = vld [vmem:[%s1211_s0 + $0x8] sm:$0xff]  ;;  %vm93_vm0 = vcmask 130048   ;;  %v963_v5 = vmov 0   ;;  %v47_v8 = vld [vmem:[%s1213_s2 + $0x10] sm:$0xff] }
   0x4   :  { %v35_v3 = vld [vmem:[%s1212_s1] sm:$0xff]  ;;  %v884_v4 = vpack.c.bf16 %v44_v2, %v43_v1  ;;  %937 = vset.pattern.permute.xlu0 %v963_v5  ;;  %938 = vset.pattern.permute.xlu1 %v963_v5  ;;  %v36_v7 = vld [vmem:[%s1212_s1 + $0x8] sm:$0xff]  ;;  %v37_v9 = vld [vmem:[%s1212_s1 + $0x10] sm:$0xff] }
   0x5   :  { %797 = vmatprep.mubr.msk.f32.mxu0 %vm93_vm0, %v35_v3  ;;  %v45_v6 = vld [vmem:[%s1213_s2] sm:$0xff]  ;;  %v46_v10 = vld [vmem:[%s1213_s2 + $0x8] sm:$0xff]  ;;  %65 = vperm.xlu1 %938, %v47_v8   ;;  %v48_v11 = vld [vmem:[%s1213_s2 + $0x18] sm:$0xff] }
   0x6   :  { %885 = vmatprep.subr.bf16.mxu0 %v884_v4  ;;  %55 = vperm.xlu0 %937, %v45_v6   ;;  %v38_v12 = vld [vmem:[%s1212_s1 + $0x18] sm:$0xff]  ;;  %v39_v13 = vld [vmem:[%s1212_s1 + $0x20] sm:$0xff]  ;;  %v50_v15 = vld [vmem:[%s1213_s2 + $0x28] sm:$0xff] }
   0x7   :  { %887 = vmatpush3.bf16.msra.mxu0 %v884_v4  ;;  %v49_v14 = vld [vmem:[%s1213_s2 + $0x20] sm:$0xff] }
   0x9   :  { %70 = vperm.xlu1 %938, %v48_v11  }
   0xa   :  { %798 = vmatmul.mubr.msk.f32.vlgmr.msra.gmra.mrb[0].mxu0 %vm93_vm0, %v36_v7  ;;  %60 = vperm.xlu0 %937, %v46_v10  }
   0xb   :  { %800 = vmatprep.mubr.msk.f32.mxu0 %vm93_vm0, %v37_v9 }
   0xe   :  { %801 = vmatmul.mubr.msk.f32.gmra.mrb[2].mxu0 %vm93_vm0, %v38_v12 }
   0xf   :  { %16 = vsyncpa [#allocation4], 0  ;;  %803 = vmatprep.mubr.msk.f32.mxu0 %vm93_vm0, %v39_v13  ;;  %v40_v16 = vld [vmem:[%s1212_s1 + $0x28] sm:$0xff]  ;;  %75 = vperm.xlu0 %937, %v49_v14   ;;  %v41_v17 = vld [vmem:[%s1212_s1 + $0x30] sm:$0xff]  ;;  %vm287_vm1 = vcmask 523264   ;;  %vm965_vm2 = vmmov 0  }
  0x10   :  { %v51_v18 = vld [vmem:[%s1213_s2 + $0x30] sm:$0xff]  ;;  %80 = vperm.xlu1 %938, %v50_v15   ;;  %v52_v19 = vld [vmem:[%s1213_s2 + $0x38] sm:$0xff]  ;;  %v239_v21 = vld [vmem:[%s1215_s4] sm:$0xff]  ;;  %s967_s30 = smov [#allocation3]  }
  0x11   :  { %v42_v20 = vld [vmem:[%s1212_s1 + $0x38] sm:$0xff]  ;;  %v240_v22 = vld [vmem:[%s1215_s4 + $0x8] sm:$0xff]  ;;  %v241_v23 = vld [vmem:[%s1215_s4 + $0x10] sm:$0xff]  ;;  %s709_s10 = sshll.u32 %s967_s30, 4  ;;  %s710_s10 = int_to_ptr.vmem [resolvable:$true] %s709_s10 }
  0x12   :  { %804 = vmatmul.mubr.msk.f32.gmra.mrb[4].mxu0 %vm93_vm0, %v40_v16  ;;  %v242_v24 = vld [vmem:[%s1215_s4 + $0x18] sm:$0xff]  ;;  %v243_v25 = vld [vmem:[%s1215_s4 + $0x20] sm:$0xff]  ;;  %v244_v26 = vld [vmem:[%s1215_s4 + $0x28] sm:$0xff]  ;;  %s939_s11 = scalar_lea.vmem %s710_s10, 16  ;;  %s943_s12 = scalar_lea.vmem %s710_s10, 32 }
  0x13   :  { %806 = vmatprep.mubr.msk.f32.mxu0 %vm93_vm0, %v41_v17  ;;  %85 = vperm.xlu0 %937, %v51_v18   ;;  %v245_v27 = vld [vmem:[%s1215_s4 + $0x30] sm:$0xff]  ;;  %v246_v28 = vld [vmem:[%s1215_s4 + $0x38] sm:$0xff]  ;;  %v433_v29 = vld [vmem:[%s1217_s6] sm:$0xff]  ;;  %p940_p0 = scmp.ne.s32.totalorder %s710_s10, %s939_s11  ;;  %p944_p1 = scmp.lt.s32.totalorder %s710_s10, %s710_s10 }
  0x14   :  { %90 = vperm.xlu1 %938, %v52_v19   ;;  %v434_v30 = vld [vmem:[%s1217_s6 + $0x8] sm:$0xff]  ;;  %v435_v31 = vld [vmem:[%s1217_s6 + $0x10] sm:$0xff]  ;;  %v436_v32 = vld [vmem:[%s1217_s6 + $0x18] sm:$0xff]  ;;  %p945_p2 = scmp.lt.s32.totalorder %s943_s12, %s939_s11 }
  0x15   :  { %v437_v33 = vld [vmem:[%s1217_s6 + $0x20] sm:$0xff]  ;;  %v438_v34 = vld [vmem:[%s1217_s6 + $0x28] sm:$0xff]  ;;  %v439_v35 = vld [vmem:[%s1217_s6 + $0x30] sm:$0xff] }
  0x16   :  { %807 = vmatmul.mubr.msk.f32.gmra.mrb[6].mxu0 %vm93_vm0, %v42_v20  ;;  %v440_v36 = vld [vmem:[%s1217_s6 + $0x38] sm:$0xff]  ;;  %v619_v37 = vld [vmem:[#allocation2] sm:$0x1]  ;;  %v232_v11 = vld [vmem:[%s1214_s3 + $0x8] sm:$0xff]  ;;  %p946_p3 = por %p945_p2, %p944_p1 }
  0x17   :  { %249 = vperm.xlu0 %937, %v239_v21   ;;  %v231_v38 = vld [vmem:[%s1214_s3] sm:$0xff]  ;;  %v233_v12 = vld [vmem:[%s1214_s3 + $0x10] sm:$0xff]  ;;  %v234_v13 = vld [vmem:[%s1214_s3 + $0x18] sm:$0xff] }
  0x18   :  { %254 = vperm.xlu1 %938, %v240_v22   ;;  %825 = vmatprep.mubr.msk.f32.mxu1 %vm287_vm1, %v231_v38  ;;  %v235_v14 = vld [vmem:[%s1214_s3 + $0x20] sm:$0xff]  ;;  %v236_v15 = vld [vmem:[%s1214_s3 + $0x28] sm:$0xff]  ;;  %v237_v16 = vld [vmem:[%s1214_s3 + $0x30] sm:$0xff]  ;;  %p947_p4 = pnand %p946_p3, %p940_p0 }
  0x19   :  { %v238_v17 = vld [vmem:[%s1214_s3 + $0x38] sm:$0xff]  ;;  %v425_v18 = vld [vmem:[%s1216_s5] sm:$0xff] }
  0x1a   :  { %853 = vmatprep.mubr.msk.f32.mxu0 %vm287_vm1, %v425_v18 }
  0x1b   :  { %259 = vperm.xlu0 %937, %v241_v23  }
  0x1c   :  { %264 = vperm.xlu1 %938, %v242_v24  }
  0x1f   :  { %269 = vperm.xlu0 %937, %v243_v25  }
  0x20   :  { %274 = vperm.xlu1 %938, %v244_v26  }
  0x23   :  { %279 = vperm.xlu0 %937, %v245_v27  }
  0x24   :  { %284 = vperm.xlu1 %938, %v246_v28  }
  0x27   :  { %443 = vperm.xlu0 %937, %v433_v29  }
  0x28   :  { %448 = vperm.xlu1 %938, %v434_v30  }
  0x2b   :  { %453 = vperm.xlu0 %937, %v435_v31  }
  0x2c   :  { %458 = vperm.xlu1 %938, %v436_v32  }
  0x2f   :  { %463 = vperm.xlu0 %937, %v437_v33  }
  0x30   :  { %468 = vperm.xlu1 %938, %v438_v34  }
  0x33   :  { %473 = vperm.xlu0 %937, %v439_v35  }
  0x34   :  { %478 = vperm.xlu1 %938, %v440_v36  }
  0x37   :  { %622 = vperm.xlu0 %937, %v619_v37  }
  0x84   :  { %v66_v40 = vpop.permute.xlu1 %65 }
  0x85   :  { %v56_v39 = vpop.permute.xlu0 %55 }
  0x88   :  { %v71_v42 = vpop.permute.xlu1 %70 }
  0x89   :  { %v61_v41 = vpop.permute.xlu0 %60 }
  0x8e   :  { %v76_v55 = vpop.permute.xlu0 %75 }
  0x8f   :  { %v81_v52 = vpop.permute.xlu1 %80 }
  0x92   :  { %v86_v3 = vpop.permute.xlu0 %85 }
  0x93   :  { %v91_v0 = vpop.permute.xlu1 %90 }
  0x96   :  { %v250_v20 = vpop.permute.xlu0 %249 }
  0x97   :  { %v255_v19 = vpop.permute.xlu1 %254 }
  0x9a   :  { %v260_v23 = vpop.permute.xlu0 %259 }
  0x9b   :  { %v265_v21 = vpop.permute.xlu1 %264 }
  0x9e   :  { %v270_v35 = vpop.permute.xlu0 %269 }
  0x9f   :  { %v275_v32 = vpop.permute.xlu1 %274 }
  0xdd   :  { %v799_v43 = vpop.f32.mrb[0].mxu0 }
  0xde   :  { %v190_v44 = vadd.f32 %v799_v43, %v61_v41  ;;  %v184_v45 = vpop.f32.mrb[1].mxu0 }
  0xdf   :  { %v185_v46 = vadd.f32 %v184_v45, %v56_v39 }
  0xe0   :  { %v224_v47 = vmax.f32 %v190_v44, 0.0  ;;  %v285_v44 = vpop.permute.xlu1 %284 }
  0xe1   :  { %v223_v48 = vmax.f32 %v185_v46, 0.0  ;;  %v802_v49 = vpop.f32.mrb[2].mxu0 }
  0xe2   :  { %v200_v50 = vadd.f32 %v802_v49, %v71_v42  ;;  %v194_v51 = vpop.f32.mrb[3].mxu0 }
  0xe3   :  { %v195_v53 = vadd.f32 %v194_v51, %v66_v40  ;;  %v888_v54 = vpack.c.bf16 %v224_v47, %v223_v48  ;;  %v280_v47 = vpop.permute.xlu0 %279 }
  0xe4   :  { %v226_v56 = vmax.f32 %v200_v50, 0.0 }
  0xe5   :  { %v225_v57 = vmax.f32 %v195_v53, 0.0  ;;  %v805_v58 = vpop.f32.mrb[4].mxu0  ;;  %889 = vmatprep.subr.bf16.mxu1 %v888_v54 }
  0xe6   :  { %v210_v59 = vadd.f32 %v805_v58, %v81_v52  ;;  %v204_v60 = vpop.f32.mrb[5].mxu0  ;;  %891 = vmatpush3.bf16.msra.mxu1 %v888_v54  ;;  %v429_v58 = vld [vmem:[%s1216_s5 + $0x20] sm:$0xff] }
  0xe7   :  { %v892_v61 = vpack.c.bf16 %v226_v56, %v225_v57  ;;  %v205_v62 = vadd.f32 %v204_v60, %v76_v55  ;;  %v426_v55 = vld [vmem:[%s1216_s5 + $0x8] sm:$0xff]  ;;  %v427_v56 = vld [vmem:[%s1216_s5 + $0x10] sm:$0xff]  ;;  %v428_v57 = vld [vmem:[%s1216_s5 + $0x18] sm:$0xff] }
  0xe8   :  { %v228_v63 = vmax.f32 %v210_v59, 0.0  ;;  %v430_v59 = vld [vmem:[%s1216_s5 + $0x28] sm:$0xff]  ;;  %v431_v60 = vld [vmem:[%s1216_s5 + $0x30] sm:$0xff] }
  0xe9   :  { %v227_v1 = vmax.f32 %v205_v62, 0.0  ;;  %v808_v2 = vpop.f32.mrb[6].mxu0  ;;  %893 = vmatprep.subr.bf16.mxu1 %v892_v61  ;;  %v964_v62 = vmov 0.0|0.0  }
  0xea   :  { %v220_v4 = vadd.f32 %v808_v2, %v91_v0  ;;  %v214_v5 = vpop.f32.mrb[7].mxu0  ;;  %895 = vmatpush3.bf16.msra.mxu1 %v892_v61  ;;  %v432_v61 = vld [vmem:[%s1216_s5 + $0x38] sm:$0xff]  ;;  %v449_v0 = vpop.permute.xlu1 %448 }
  0xeb   :  { %v896_v6 = vpack.c.bf16 %v228_v63, %v227_v1  ;;  %v215_v7 = vadd.f32 %v214_v5, %v86_v3  ;;  %v966_v63 = vmov 0.0   ;;  %v444_v1 = vpop.permute.xlu0 %443 }
  0xec   :  { %v230_v8 = vmax.f32 %v220_v4, 0.0 }
  0xed   :  { %v229_v9 = vmax.f32 %v215_v7, 0.0  ;;  %897 = vmatprep.subr.bf16.mxu1 %v896_v6 }
  0xee   :  { %899 = vmatpush3.bf16.msra.mxu1 %v896_v6  ;;  %v459_v2 = vpop.permute.xlu1 %458 }
  0xef   :  { %v900_v10 = vpack.c.bf16 %v230_v8, %v229_v9  ;;  %v454_v4 = vpop.permute.xlu0 %453 }
  0xf1   :  { %901 = vmatprep.subr.bf16.mxu1 %v900_v10 }
  0xf2   :  { %903 = vmatpush3.bf16.msra.mxu1 %v900_v10 }
  0xf3   :  { %920 = vmatprep.subr.bf16.mxu1 %v964_v62 }
  0xf5   :  { %826 = vmatmul.mubr.msk.f32.vlgmr.msra.gmra.mrb[0].mxu1 %vm287_vm1, %v232_v11 }
  0xf6   :  { %828 = vmatprep.mubr.msk.f32.mxu1 %vm287_vm1, %v233_v12 }
  0xf9   :  { %829 = vmatmul.mubr.msk.f32.gmra.mrb[2].mxu1 %vm287_vm1, %v234_v13  ;;  %v469_v13 = vpop.permute.xlu1 %468 }
  0xfa   :  { %831 = vmatprep.mubr.msk.f32.mxu1 %vm287_vm1, %v235_v14 }
  0xfd   :  { %832 = vmatmul.mubr.msk.f32.gmra.mrb[4].mxu1 %vm287_vm1, %v236_v15 }
  0xfe   :  { %834 = vmatprep.mubr.msk.f32.mxu1 %vm287_vm1, %v237_v16  ;;  %v464_v16 = vpop.permute.xlu0 %463 }
 0x101   :  { %835 = vmatmul.mubr.msk.f32.gmra.mrb[6].mxu1 %vm287_vm1, %v238_v17 }
 0x102   :  { %881 = vmatprep.mubr.msk.f32.mxu1 %vm965_vm2, %v966_v63 }
 0x1c8   :  { %v827_v22 = vpop.f32.mrb[0].mxu1 }
 0x1c9   :  { %v384_v24 = vadd.f32 %v827_v22, %v255_v19  ;;  %v378_v25 = vpop.f32.mrb[1].mxu1 }
 0x1ca   :  { %v379_v26 = vadd.f32 %v378_v25, %v250_v20  ;;  %v479_v25 = vpop.permute.xlu1 %478 }
 0x1cb   :  { %v418_v27 = vmax.f32 %v384_v24, 0.0 }
 0x1cc   :  { %v417_v28 = vmax.f32 %v379_v26, 0.0  ;;  %v830_v29 = vpop.f32.mrb[2].mxu1 }
 0x1cd   :  { %v394_v30 = vadd.f32 %v830_v29, %v265_v21  ;;  %v388_v31 = vpop.f32.mrb[3].mxu1 }
 0x1ce   :  { %v904_v33 = vpack.c.bf16 %v418_v27, %v417_v28  ;;  %v389_v34 = vadd.f32 %v388_v31, %v260_v23  ;;  %v474_v28 = vpop.permute.xlu0 %473 }
 0x1cf   :  { %v420_v36 = vmax.f32 %v394_v30, 0.0 }
 0x1d0   :  { %v419_v37 = vmax.f32 %v389_v34, 0.0  ;;  %v833_v38 = vpop.f32.mrb[4].mxu1  ;;  %905 = vmatprep.subr.bf16.mxu0 %v904_v33 }
 0x1d1   :  { %v404_v39 = vadd.f32 %v833_v38, %v275_v32  ;;  %v398_v40 = vpop.f32.mrb[5].mxu1  ;;  %907 = vmatpush3.bf16.msra.mxu0 %v904_v33 }
 0x1d2   :  { %v908_v41 = vpack.c.bf16 %v420_v36, %v419_v37  ;;  %v399_v42 = vadd.f32 %v398_v40, %v270_v35  ;;  %v618_v36 = vld [vmem:[%s1218_s7] sm:$0x1]  ;;  %v625_v37 = vlaneseq  ;;  %v623_v40 = vpop.permute.xlu0 %622 }
 0x1d3   :  { %v422_v43 = vmax.f32 %v404_v39, 0.0 }
 0x1d4   :  { %v421_v45 = vmax.f32 %v399_v42, 0.0  ;;  %v836_v46 = vpop.f32.mrb[6].mxu1  ;;  %909 = vmatprep.subr.bf16.mxu0 %v908_v41  ;;  %v626_v38 = vshrl.u32 %v625_v37, 7 }
 0x1d5   :  { %v414_v48 = vadd.f32 %v836_v46, %v285_v44  ;;  %v408_v49 = vpop.f32.mrb[7].mxu1  ;;  %911 = vmatpush3.bf16.msra.mxu0 %v908_v41 }
 0x1d6   :  { %v912_v50 = vpack.c.bf16 %v422_v43, %v421_v45  ;;  %v409_v51 = vadd.f32 %v408_v49, %v280_v47  ;;  %v627_v39 = vsub.s32 0, %v626_v38 }
 0x1d7   :  { %v424_v52 = vmax.f32 %v414_v48, 0.0 }
 0x1d8   :  { %v423_v53 = vmax.f32 %v409_v51, 0.0  ;;  %913 = vmatprep.subr.bf16.mxu0 %v912_v50  ;;  %v628_v41 = vrot.slane %v623_v40, %v627_v39 }
 0x1d9   :  { %915 = vmatpush3.bf16.msra.mxu0 %v912_v50 }
 0x1da   :  { %v916_v54 = vpack.c.bf16 %v424_v52, %v423_v53 }
 0x1dc   :  { %917 = vmatprep.subr.bf16.mxu0 %v916_v54 }
 0x1dd   :  { %919 = vmatpush3.bf16.msra.mxu0 %v916_v54 }
 0x1e0   :  { %854 = vmatmul.mubr.msk.f32.vlgmr.msra.gmra.mrb[8].mxu0 %vm287_vm1, %v426_v55 }
 0x1e1   :  { %856 = vmatprep.mubr.msk.f32.mxu0 %vm287_vm1, %v427_v56 }
 0x1e4   :  { %857 = vmatmul.mubr.msk.f32.gmra.mrb[10].mxu0 %vm287_vm1, %v428_v57 }
 0x1e5   :  { %859 = vmatprep.mubr.msk.f32.mxu0 %vm287_vm1, %v429_v58 }
 0x1e8   :  { %860 = vmatmul.mubr.msk.f32.gmra.mrb[12].mxu0 %vm287_vm1, %v430_v59 }
 0x1e9   :  { %862 = vmatprep.mubr.msk.f32.mxu0 %vm287_vm1, %v431_v60 }
 0x1ec   :  { %863 = vmatmul.mubr.msk.f32.gmra.mrb[14].mxu0 %vm287_vm1, %v432_v61 }
 0x2b3   :  { %v855_v3 = vpop.f32.mrb[8].mxu0 }
 0x2b4   :  { %v577_v5 = vadd.f32 %v855_v3, %v449_v0  ;;  %v571_v6 = vpop.f32.mrb[9].mxu0 }
 0x2b5   :  { %v572_v7 = vadd.f32 %v571_v6, %v444_v1 }
 0x2b6   :  { %v611_v8 = vmax.f32 %v577_v5, 0.0 }
 0x2b7   :  { %v610_v9 = vmax.f32 %v572_v7, 0.0  ;;  %v858_v10 = vpop.f32.mrb[10].mxu0 }
 0x2b8   :  { %v587_v11 = vadd.f32 %v858_v10, %v459_v2  ;;  %v581_v12 = vpop.f32.mrb[11].mxu0 }
 0x2b9   :  { %v921_v14 = vpack.c.bf16 %v611_v8, %v610_v9  ;;  %v582_v15 = vadd.f32 %v581_v12, %v454_v4 }
 0x2ba   :  { %v613_v17 = vmax.f32 %v587_v11, 0.0 }
 0x2bb   :  { %v612_v18 = vmax.f32 %v582_v15, 0.0  ;;  %v861_v19 = vpop.f32.mrb[12].mxu0  ;;  %922 = vmatpush3.bf16.msra.mxu1 %v921_v14 }
 0x2bc   :  { %v597_v20 = vadd.f32 %v861_v19, %v469_v13  ;;  %v591_v21 = vpop.f32.mrb[13].mxu0  ;;  %923 = vmatprep.subr.bf16.mxu1 %v964_v62 }
 0x2bd   :  { %v924_v22 = vpack.c.bf16 %v613_v17, %v612_v18  ;;  %v592_v23 = vadd.f32 %v591_v21, %v464_v16 }
 0x2be   :  { %v615_v24 = vmax.f32 %v597_v20, 0.0 }
 0x2bf   :  { %v614_v26 = vmax.f32 %v592_v23, 0.0  ;;  %v864_v27 = vpop.f32.mrb[14].mxu0  ;;  %925 = vmatpush3.bf16.msra.mxu1 %v924_v22 }
 0x2c0   :  { %v607_v29 = vadd.f32 %v864_v27, %v479_v25  ;;  %v601_v30 = vpop.f32.mrb[15].mxu0  ;;  %926 = vmatprep.subr.bf16.mxu1 %v964_v62 }
 0x2c1   :  { %v927_v31 = vpack.c.bf16 %v615_v24, %v614_v26  ;;  %v602_v32 = vadd.f32 %v601_v30, %v474_v28 }
 0x2c2   :  { %v617_v33 = vmax.f32 %v607_v29, 0.0 }
 0x2c3   :  { %v616_v34 = vmax.f32 %v602_v32, 0.0  ;;  %928 = vmatpush3.bf16.msra.mxu1 %v927_v31 }
 0x2c4   :  { %929 = vmatprep.subr.bf16.mxu1 %v964_v62 }
 0x2c5   :  { %v930_v35 = vpack.c.bf16 %v617_v33, %v616_v34 }
 0x2c7   :  { %931 = vmatpush3.bf16.msra.mxu1 %v930_v35 }
 0x2ca   :  { %882 = vmatmul.mubr.msk.f32.vlgmr.msra.gmra.mrb[8].mxu1 %vm287_vm1, %v618_v36 }
 0x39d   :  { %v698_v42 = vpop.f32.mrb[8].mxu1 }
 0x39e   :  { %v699_v43 = vadd.f32 %v698_v42, %v628_v41  ;;  %v883_v44 = vpop.f32.mrb[9].mxu1 }
 0x3a0   :  { %702 = vst [vmem:[#allocation3] sm:$0x1] %v699_v43 }
 0x3a1   :  { %950 = shalt.err (!%p947_p4)
}
 0x3a2   :  { %s951_s14 = scalar_lea.hbm %s1220_s9, 16 }
 0x3a3   :  { %p952_p5 = scmp.ne.s32.totalorder %s1220_s9, %s951_s14  ;;  %p955_p6 = scmp.lt.u32.totalorder %s951_s14, %s1220_s9 }
 0x3a5   :  { %p957_p7 = pnand %p955_p6, %p952_p5 }
 0x3a7   :  { %960 = shalt.err (!%p957_p7)
}
 0x3a8   :  { %712 = dma.vmem_to_hbm [thread:$0]  %s710_s10, 16, %s1220_s9, [#allocation4]  }
 0x3a9   :  { %961 = dma.done.wait [#allocation4], 16  }
 0x3aa   :  { %962 = vsyncadd [#allocation4], 4294967280 }
 0x3ab   :  { %716 = vsyncpa [#allocation4], 1 }

</bundles_post_ra>
